<compile_context>
chip_gen: v7x
topology: tpu7x:2x2x1
jax: 0.10.0
libtpu: 0.0.40
codegen_flags: <defaults>
</compile_context>

<pallas_src>
import functools

import numpy as np
import jax
import jax.numpy as jnp
from jax.experimental import pallas as pl
from jax.experimental.pallas import tpu as pltpu


def _round_up(x, m):
    return ((x + m - 1) // m) * m


# ----------------------------------------------------------------------------
# In-kernel helpers
# ----------------------------------------------------------------------------
def _fill_padded(x_ref, pad_ref, pad_top, pad_left, hin, win):
    """Zero the border strips of the padded scratch and copy the interior."""
    cblk, hpad, wpad = pad_ref.shape
    zdt = pad_ref.dtype
    if pad_top > 0:
        pad_ref[:, 0:pad_top, :] = jnp.zeros((cblk, pad_top, wpad), zdt)
    if pad_top + hin < hpad:
        pad_ref[:, pad_top + hin:hpad, :] = jnp.zeros(
            (cblk, hpad - pad_top - hin, wpad), zdt)
    if pad_left > 0:
        pad_ref[:, :, 0:pad_left] = jnp.zeros((cblk, hpad, pad_left), zdt)
    if pad_left + win < wpad:
        pad_ref[:, :, pad_left + win:wpad] = jnp.zeros(
            (cblk, hpad, wpad - pad_left - win), zdt)
    pad_ref[:, pad_top:pad_top + hin, pad_left:pad_left + win] = x_ref[...]


def _blur_sep_kernel(x_ref, o_ref, pad_ref, *, taps_w, taps_h,
                     pad_top, pad_left, hin, win, hout, wout):
    """Separable blur with fused zero padding.

    x_ref  : (cblk, hin, win)            unpadded input planes
    pad_ref: (cblk, hpad8, wpad128)      zero-bordered, lane-aligned scratch
    o_ref  : (cblk, hout, wout)          output planes
    """
    cblk, hpad, wpad = pad_ref.shape
    _fill_padded(x_ref, pad_ref, pad_top, pad_left, hin, win)

    xv = pad_ref[...].astype(jnp.float32)          # (cblk, hpad, wpad), f32
    # Horizontal pass: lane-axis shifts as XLU rolls on dense 128-aligned rows.
    # (wrap-around only touches columns >= wout, which are cropped below)
    x2 = xv.reshape(cblk * hpad, wpad)             # tile-aligned (hpad % 8 == 0)
    hacc2 = x2 * taps_w[0]
    for j in range(1, len(taps_w)):
        hacc2 = hacc2 + pltpu.roll(x2, shift=wpad - j, axis=1) * taps_w[j]
    hacc = hacc2.reshape(cblk, hpad, wpad)

    # Vertical pass: sublane-axis offsets.
    acc = hacc[:, 0:hout, :] * taps_h[0]
    for i in range(1, len(taps_h)):
        acc = acc + hacc[:, i:i + hout, :] * taps_h[i]

    # Single lane crop at the final store.
    o_ref[...] = acc[:, :, 0:wout].astype(o_ref.dtype)


def _blur_2d_kernel(x_ref, o_ref, pad_ref, *, taps, pad_top, pad_left,
                    hin, win, hout, wout):
    """Generic (non-separable) fallback: kh x kw taps with fused padding."""
    cblk, hpad, wpad = pad_ref.shape
    _fill_padded(x_ref, pad_ref, pad_top, pad_left, hin, win)

    xv = pad_ref[...].astype(jnp.float32)
    x2 = xv.reshape(cblk * hpad, wpad)
    kh, kw = len(taps), len(taps[0])
    acc = None
    for j in range(kw):
        xs2 = x2 if j == 0 else pltpu.roll(x2, shift=wpad - j, axis=1)
        xs = xs2.reshape(cblk, hpad, wpad)
        for i in range(kh):
            t = xs[:, i:i + hout, :] * taps[i][j]
            acc = t if acc is None else acc + t
    o_ref[...] = acc[:, :, 0:wout].astype(o_ref.dtype)


# ----------------------------------------------------------------------------
# Block-size selection (VMEM-budget + v7x grid-evenness aware)
# ----------------------------------------------------------------------------
def _pick_block(nc, per_chan_bytes, budget_bytes):
    per_chan_bytes = max(1, int(per_chan_bytes))
    max_c = max(1, budget_bytes // per_chan_bytes)
    fits = [d for d in range(1, nc + 1) if nc % d == 0 and d <= max_c]
    if not fits:
        return 1
    even = [d for d in fits if (nc // d) % 2 == 0]   # even grid -> balanced 2-TC split
    if even:
        return max(even)
    multi = [d for d in fits if nc // d >= 2]        # >= 2 steps -> pipelining
    if multi:
        return max(multi)
    return max(fits)


# ----------------------------------------------------------------------------
# BlurKernel module
# ----------------------------------------------------------------------------
def make_kernel_np(k):
    k = np.asarray(k, dtype=np.float32)
    if k.ndim == 1:
        k2 = np.outer(k, k)
    else:
        k2 = k
    return k2 / k2.sum()


class BlurKernelPallas:
    """Pallas TPU equivalent of the PyTorch BlurKernel module (up=down=1)."""

    def __init__(self, kernel, pad, upsample_factor=1):
        k_in = np.asarray(kernel, dtype=np.float64)
        k2 = make_kernel_np(kernel)                       # normalized 2-D kernel
        scale = float(upsample_factor) ** 2 if upsample_factor > 1 else 1.0
        self.kernel2d = (k2 * scale).astype(np.float32)   # mirrors torch buffer
        self.kh, self.kw = k2.shape
        self.pad = (int(pad[0]), int(pad[1]))

        # Separable detection: explicit 1-D kernel, or rank-1 2-D kernel (SVD).
        k2n = k2.astype(np.float64)
        taps_h = taps_w = None
        if k_in.ndim == 1:
            k1 = k_in / k_in.sum()
            taps_h, taps_w = k1, k1
        else:
            u, s, vt = np.linalg.svd(k2n)
            if s.size == 1 or s[1] <= 1e-7 * max(s[0], 1e-30):
                taps_h = u[:, 0] * s[0]
                taps_w = vt[0, :]
                if taps_h.sum() < 0:
                    taps_h, taps_w = -taps_h, -taps_w
        self.separable = taps_h is not None
        if self.separable:
            # flip: F.conv2d(x, flip(k)) == correlation with flipped taps
            self.taps_w = tuple(float(v) for v in taps_w[::-1])
            self.taps_h = tuple(float(v) * scale for v in taps_h[::-1])
        else:
            kf = np.flip(k2n * scale, (0, 1))
            self.taps_2d = tuple(tuple(float(v) for v in row) for row in kf)

    def __call__(self, x_nchw):
        N, C, H, W = x_nchw.shape
        p0, p1 = self.pad
        kh, kw = self.kh, self.kw

        # Negative pads crop in the wrapper (rare); positive pads fuse in-kernel.
        ct, cb = max(-p0, 0), max(-p1, 0)
        if ct or cb:
            x_nchw = x_nchw[:, :, ct:H - cb, ct:W - cb]
        Hin, Win = x_nchw.shape[2], x_nchw.shape[3]
        pt, pb = max(p0, 0), max(p1, 0)
        Hp, Wp = Hin + pt + pb, Win + pt + pb
        Hout, Wout = Hp - kh + 1, Wp - kw + 1
        assert Hin > 0 and Win > 0 and Hout > 0 and Wout > 0, \
            "pads / kernel size produce an empty output"

        NC = N * C
        xf = x_nchw.reshape(NC, Hin, Win)          # depthwise: independent planes
        in_dtype = x_nchw.dtype
        in_item = jnp.dtype(in_dtype).itemsize

        # Lane/sublane-aligned padded scratch (physically free: vregs are (8,128)).
        Hpad = _round_up(Hp, 8)
        Wpad = _round_up(Wp, 128)

        # Generation-aware VMEM budgeting.
        try:
            cap = int(pltpu.get_tpu_info().vmem_capacity_bytes)
            if cap <= 0:
                cap = 64 << 20
        except Exception:
            cap = 64 << 20
        vmem_limit = int(cap * 3 // 4)
        per_chan = (2 * Hin * Win * in_item          # double-buffered input block
                    + 2 * Hout * Wout * in_item      # double-buffered output block
                    + Hpad * Wpad * in_item          # padded VMEM scratch
                    + 3 * Hpad * Wpad * 4)           # f32 xv / hacc / acc temporaries
        budget = max(2 << 20, min(vmem_limit // 3, 12 << 20))
        cblk = _pick_block(NC, per_chan, budget)
        grid = (NC // cblk,)

        if self.separable:
            kern = functools.partial(
                _blur_sep_kernel, taps_w=self.taps_w, taps_h=self.taps_h,
                pad_top=pt, pad_left=pt, hin=Hin, win=Win, hout=Hout, wout=Wout)
            flops_per_out = 2 * (len(self.taps_w) + len(self.taps_h))
        else:
            kern = functools.partial(
                _blur_2d_kernel, taps=self.taps_2d,
                pad_top=pt, pad_left=pt, hin=Hin, win=Win, hout=Hout, wout=Wout)
            flops_per_out = 2 * kh * kw

        cost = pl.CostEstimate(
            flops=int(flops_per_out * NC * Hout * Wout),
            transcendentals=0,
            bytes_accessed=int(NC * (Hin * Win + Hout * Wout) * in_item))

        out = pl.pallas_call(
            kern,
            out_shape=jax.ShapeDtypeStruct((NC, Hout, Wout), in_dtype),
            grid=grid,
            in_specs=[pl.BlockSpec((cblk, Hin, Win), lambda i: (i, 0, 0))],
            out_specs=pl.BlockSpec((cblk, Hout, Wout), lambda i: (i, 0, 0)),
            scratch_shapes=[pltpu.VMEM((cblk, Hpad, Wpad), in_dtype)],
            compiler_params=pltpu.CompilerParams(
                dimension_semantics=("parallel",),
                vmem_limit_bytes=vmem_limit),
            cost_estimate=cost,
        )(xf)
        return out.reshape(N, C, Hout, Wout)


# ----------------------------------------------------------------------------
# Pure-JAX reference (mirrors upfirdn2d_native with up=down=1) for validation
# ----------------------------------------------------------------------------
def upfirdn2d_ref(x, k2d, pad):
    p0, p1 = pad
    xp = jnp.pad(x.astype(jnp.float32), ((0, 0), (0, 0),
                                         (max(p0, 0), max(p1, 0)),
                                         (max(p0, 0), max(p1, 0))))
    if p0 < 0 or p1 < 0:
        xp = xp[:, :,
                max(-p0, 0): xp.shape[2] - max(-p1, 0),
                max(-p0, 0): xp.shape[3] - max(-p1, 0)]
    kh, kw = k2d.shape
    Hout = xp.shape[2] - kh + 1
    Wout = xp.shape[3] - kw + 1
    kf = np.flip(np.asarray(k2d, np.float64), (0, 1))
    acc = jnp.zeros((x.shape[0], x.shape[1], Hout, Wout), jnp.float32)
    for i in range(kh):
        for j in range(kw):
            acc = acc + xp[:, :, i:i + Hout, j:j + Wout] * float(kf[i, j])
    return acc


# ----------------------------------------------------------------------------
if __name__ == "__main__":
    key = jax.random.PRNGKey(0)
    x = jax.random.normal(key, (2, 4, 16, 16), jnp.float32)   # NCHW, like PyTorch

    blur = BlurKernelPallas(kernel=[1, 3, 3, 1], pad=(2, 1))
    fwd = jax.jit(blur.__call__)

    out = jax.block_until_ready(fwd(x))

    ref = upfirdn2d_ref(x, blur.kernel2d, blur.pad)
    assert out.shape == ref.shape == (2, 4, 16, 16), (out.shape, ref.shape)
    assert bool(jnp.all(jnp.isfinite(out)))
    assert bool(jnp.allclose(out.astype(jnp.float32), ref, atol=1e-4, rtol=1e-4))

    # rank-1 2-D kernels route through the separable path (host-side check only)
    assert BlurKernelPallas(np.outer([1, 3, 3, 1], [1, 3, 3, 1]), pad=(2, 1)).separable

    print("KERNEL_OK")
</pallas_src>

<mosaic_0001>
module attributes {stable_mosaic.version = 11 : i64} {
  func.func @_blur_sep_kernel(%arg0: i32, %arg1: memref<4x16x16xf32, #tpu.memory_space<vmem>>, %arg2: memref<4x16x16xf32, #tpu.memory_space<vmem>>, %arg3: memref<4x24x128xf32, #tpu.memory_space<vmem>>) attributes {dimension_semantics = [#tpu.dimension_semantics<parallel>], iteration_bounds = array<i64: 2>, scalar_prefetch = 0 : i64, scratch_operands = 1 : i64, tpu.core_type = #tpu.core_type<tc>, window_params = [{transform_indices = @transform_0, window_bounds = array<i64: 4, 16, 16>}, {transform_indices = @transform_1, window_bounds = array<i64: 4, 16, 16>}]} {
    %cst = arith.constant 0.000000e+00 : f32
    %0 = vector.broadcast %cst : f32 to vector<4x2x128xf32>
    %c0 = arith.constant 0 : index
    %c0_0 = arith.constant 0 : index
    %c0_1 = arith.constant 0 : index
    %1 = vector.load %arg3[%c0, %c0_0, %c0_1] : memref<4x24x128xf32, #tpu.memory_space<vmem>>, vector<4x2x128xf32>
    tpu.vector_store %arg3[%c0, %c0_0, %c0_1], %0 {strides = array<i32>} : memref<4x24x128xf32, #tpu.memory_space<vmem>>, vector<4x2x128xf32>,
    %cst_2 = arith.constant 0.000000e+00 : f32
    %2 = vector.broadcast %cst_2 : f32 to vector<4x6x128xf32>
    %c0_3 = arith.constant 0 : index
    %c18 = arith.constant 18 : index
    %c0_4 = arith.constant 0 : index
    %3 = vector.load %arg3[%c0_3, %c18, %c0_4] : memref<4x24x128xf32, #tpu.memory_space<vmem>>, vector<4x6x128xf32>
    tpu.vector_store %arg3[%c0_3, %c18, %c0_4], %2 {strides = array<i32>} : memref<4x24x128xf32, #tpu.memory_space<vmem>>, vector<4x6x128xf32>,
    %cst_5 = arith.constant 0.000000e+00 : f32
    %4 = vector.broadcast %cst_5 : f32 to vector<4x24x2xf32>
    %c0_6 = arith.constant 0 : index
    %c0_7 = arith.constant 0 : index
    %c0_8 = arith.constant 0 : index
    %5 = vector.load %arg3[%c0_6, %c0_7, %c0_8] : memref<4x24x128xf32, #tpu.memory_space<vmem>>, vector<4x24x2xf32>
    tpu.vector_store %arg3[%c0_6, %c0_7, %c0_8], %4 {strides = array<i32>} : memref<4x24x128xf32, #tpu.memory_space<vmem>>, vector<4x24x2xf32>,
    %cst_9 = arith.constant 0.000000e+00 : f32
    %6 = vector.broadcast %cst_9 : f32 to vector<4x24x110xf32>
    %c0_10 = arith.constant 0 : index
    %c0_11 = arith.constant 0 : index
    %c18_12 = arith.constant 18 : index
    %7 = vector.load %arg3[%c0_10, %c0_11, %c18_12] : memref<4x24x128xf32, #tpu.memory_space<vmem>>, vector<4x24x110xf32>
    tpu.vector_store %arg3[%c0_10, %c0_11, %c18_12], %6 {strides = array<i32>} : memref<4x24x128xf32, #tpu.memory_space<vmem>>, vector<4x24x110xf32>,
    %c0_13 = arith.constant 0 : index
    %c0_14 = arith.constant 0 : index
    %c0_15 = arith.constant 0 : index
    %8 = vector.load %arg1[%c0_13, %c0_14, %c0_15] : memref<4x16x16xf32, #tpu.memory_space<vmem>>, vector<4x16x16xf32>
    %c0_16 = arith.constant 0 : index
    %c2 = arith.constant 2 : index
    %c2_17 = arith.constant 2 : index
    %9 = vector.load %arg3[%c0_16, %c2, %c2_17] : memref<4x24x128xf32, #tpu.memory_space<vmem>>, vector<4x16x16xf32>
    tpu.vector_store %arg3[%c0_16, %c2, %c2_17], %8 {strides = array<i32>} : memref<4x24x128xf32, #tpu.memory_space<vmem>>, vector<4x16x16xf32>,
    %c0_18 = arith.constant 0 : index
    %c0_19 = arith.constant 0 : index
    %c0_20 = arith.constant 0 : index
    %10 = vector.load %arg3[%c0_18, %c0_19, %c0_20] : memref<4x24x128xf32, #tpu.memory_space<vmem>>, vector<4x24x128xf32>
    %11 = vector.shape_cast %10 : vector<4x24x128xf32> to vector<96x128xf32>
    %cst_21 = arith.constant 1.250000e-01 : f32
    %12 = vector.broadcast %cst_21 : f32 to vector<96x128xf32>
    %13 = arith.mulf %11, %12 : vector<96x128xf32>
    %c127_i32 = arith.constant 127 : i32
    %14 = tpu.dynamic_rotate %11 by %c127_i32 dim 1 : vector<96x128xf32>, i32 -> vector<96x128xf32>
    %cst_22 = arith.constant 3.750000e-01 : f32
    %15 = vector.broadcast %cst_22 : f32 to vector<96x128xf32>
    %16 = arith.mulf %14, %15 : vector<96x128xf32>
    %17 = arith.addf %13, %16 : vector<96x128xf32>
    %c126_i32 = arith.constant 126 : i32
    %18 = tpu.dynamic_rotate %11 by %c126_i32 dim 1 : vector<96x128xf32>, i32 -> vector<96x128xf32>
    %cst_23 = arith.constant 3.750000e-01 : f32
    %19 = vector.broadcast %cst_23 : f32 to vector<96x128xf32>
    %20 = arith.mulf %18, %19 : vector<96x128xf32>
    %21 = arith.addf %17, %20 : vector<96x128xf32>
    %c125_i32 = arith.constant 125 : i32
    %22 = tpu.dynamic_rotate %11 by %c125_i32 dim 1 : vector<96x128xf32>, i32 -> vector<96x128xf32>
    %cst_24 = arith.constant 1.250000e-01 : f32
    %23 = vector.broadcast %cst_24 : f32 to vector<96x128xf32>
    %24 = arith.mulf %22, %23 : vector<96x128xf32>
    %25 = arith.addf %21, %24 : vector<96x128xf32>
    %26 = vector.shape_cast %25 : vector<96x128xf32> to vector<4x24x128xf32>
    %27 = vector.extract_strided_slice %26 {offsets = [0, 0, 0], sizes = [4, 16, 128], strides = [1, 1, 1]} : vector<4x24x128xf32> to vector<4x16x128xf32>
    %cst_25 = arith.constant 1.250000e-01 : f32
    %28 = vector.broadcast %cst_25 : f32 to vector<4x16x128xf32>
    %29 = arith.mulf %27, %28 : vector<4x16x128xf32>
    %30 = vector.extract_strided_slice %26 {offsets = [0, 1, 0], sizes = [4, 16, 128], strides = [1, 1, 1]} : vector<4x24x128xf32> to vector<4x16x128xf32>
    %cst_26 = arith.constant 3.750000e-01 : f32
    %31 = vector.broadcast %cst_26 : f32 to vector<4x16x128xf32>
    %32 = arith.mulf %30, %31 : vector<4x16x128xf32>
    %33 = arith.addf %29, %32 : vector<4x16x128xf32>
    %34 = vector.extract_strided_slice %26 {offsets = [0, 2, 0], sizes = [4, 16, 128], strides = [1, 1, 1]} : vector<4x24x128xf32> to vector<4x16x128xf32>
    %cst_27 = arith.constant 3.750000e-01 : f32
    %35 = vector.broadcast %cst_27 : f32 to vector<4x16x128xf32>
    %36 = arith.mulf %34, %35 : vector<4x16x128xf32>
    %37 = arith.addf %33, %36 : vector<4x16x128xf32>
    %38 = vector.extract_strided_slice %26 {offsets = [0, 3, 0], sizes = [4, 16, 128], strides = [1, 1, 1]} : vector<4x24x128xf32> to vector<4x16x128xf32>
    %cst_28 = arith.constant 1.250000e-01 : f32
    %39 = vector.broadcast %cst_28 : f32 to vector<4x16x128xf32>
    %40 = arith.mulf %38, %39 : vector<4x16x128xf32>
    %41 = arith.addf %37, %40 : vector<4x16x128xf32>
    %42 = vector.extract_strided_slice %41 {offsets = [0, 0, 0], sizes = [4, 16, 16], strides = [1, 1, 1]} : vector<4x16x128xf32> to vector<4x16x16xf32>
    %c0_29 = arith.constant 0 : index
    %c0_30 = arith.constant 0 : index
    %c0_31 = arith.constant 0 : index
    %43 = vector.load %arg2[%c0_29, %c0_30, %c0_31] : memref<4x16x16xf32, #tpu.memory_space<vmem>>, vector<4x16x16xf32>
    tpu.vector_store %arg2[%c0_29, %c0_30, %c0_31], %42 {strides = array<i32>} : memref<4x16x16xf32, #tpu.memory_space<vmem>>, vector<4x16x16xf32>,
    return
  }
  func.func @transform_0(%arg0: i32) -> (i32, i32, i32) {
    %c0_i32 = arith.constant 0 : i32
    %c0_i32_0 = arith.constant 0 : i32
    %c0_i32_1 = arith.constant 0 : i32
    return %arg0, %c0_i32, %c0_i32_0 : i32, i32, i32
  }
  func.func @transform_1(%arg0: i32) -> (i32, i32, i32) {
    %c0_i32 = arith.constant 0 : i32
    %c0_i32_0 = arith.constant 0 : i32
    %c0_i32_1 = arith.constant 0 : i32
    return %arg0, %c0_i32, %c0_i32_0 : i32, i32, i32
  }
}

</mosaic_0001>

<bundles_post_ra>
// kernel: a_call__.1
= control target key start
LH: loop header
LB: loop body
LE: loop exit
PB: predicated region body
PF: predicated region fallthrough
CT: control target
= control target key end

     0   :  { %6 = vsyncpa [#allocation4], 0  ;;  %s1177_s0 = inlined_call_operand.hbm [shape: f32[8,16,16], index: 0, kind: input, shape index: {}]   ;;  %s1178_s1 = inlined_call_operand.hbm [shape: f32[8,16,16], index: 1, kind: output, shape index: {}]  }
   0x1   :  { %8 = vsyncpa [#allocation4 + $0x1], 0 }
   0x2   :  { %9 = vsyncpa [#allocation5], 0 }
   0x3   :  { %11 = vsyncpa [#allocation5 + $0x1], 0  ;;  %s839_s6 = smov 0   ;;  %s841_s7 = smov 0  }
   0x4   :  { %s843_s8 = smov 0   ;;  %s845_s9 = smov 0  }
   0x5 LB: > { %s860_s10 = sadd.s32 4294967295, %s816_s9   ;;  %s645_s11 = sadd.s32 4294967294, %s816_s9   ;;  %s816_s9 = sphi %s845_s9, %s1191_s9   ;;  %s812_s8 = sphi %s843_s8, %s1190_s8   ;;  %s808_s7 = sphi %s841_s7, %s1189_s7   ;;  %s804_s6 = sphi %s839_s6, %s1188_s6  }
   0x6   : > { %s864_s12 = sadd.s32 1, %s816_s9   ;;  %s24_s13 = sadd.s32 1, %s812_s8 }
   0x7   : > { %s21_s14 = ssub.s32 %s816_s9, %s864_s12  ;;  %p31_p0 = scmp.ne.s32.totalorder %s812_s8, %s808_s7 }
   0x8   : > { %p22_p1 = scmp.eq.s32.totalorder %s21_s14, 0  ;;  %p32_p2 = scmp.eq.s32.totalorder %s816_s9, 0 }
   0x9   : > { %p37_p3 = scmp.ne.s32.totalorder %s808_s7, %s804_s6  ;;  %p38_p4 = scmp.eq.s32.totalorder %s860_s10, 0 }
   0xa   : > { %s876_s15 = scalar_select %p22_p1, %s812_s8, %s24_s13  }
   0xb   : > { %p878_p5 = por %p32_p2, %p31_p0  ;;  %p882_p6 = por %p38_p4, %p37_p3 }
   0xc   : > { %p61_p7 = scmp.eq.s32.totalorder %s860_s10, 1  ;;  %p67_p8 = scmp.eq.s32.totalorder %s645_s11, 1 }
   0xd   : > { %p677_p10 = scmp.lt.s32.totalorder %s816_s9, 2  ;;  %s87_s20 = sand.u32 1, %s812_s8  }
   0xe   : > { %p889_p11 = por %p61_p7, %p31_p0  ;;  %p893_p12 = por %p67_p8, %p37_p3 }
   0xf   : > { %s662_s21 = sshll.u32 %s816_s9, 10  ;;  %s648_s22 = sshll.u32 %s87_s20, 6 }
  0x10   : > { %s1182_s18 = scalar_select %p889_p11, 1, 0 }
  0x11   : > { %s1183_s19 = scalar_select %p893_p12, 1, 0 }
  0x12   : > { %s902_s25 = scalar_lea.hbm %s1177_s0, %s662_s21  ;;  %s91_s26 = scalar_lea.vmem [#allocation3], %s648_s22 }
  0x13   : > { %s99_s27 = sshll.u32 %s91_s26, 4  ;;  %p906_p13 = pnand %p677_p10, %p878_p5  ;;  %s910_s27 = int_to_ptr.vmem [resolvable:$true] %s99_s27 }
  0x14   : > { %s912_s29 = scalar_lea.sflag [#allocation4], %s87_s20  ;;  %s720_s30 = scalar_lea.hbm %s902_s25, 1024 }
  0x15   : > { %p721_p0 = scmp.ne.s32.totalorder %s902_s25, %s720_s30  ;;  %p722_p1 = pneg %p906_p13 }
  0x16   : > { %s725_s4 = scalar_lea.hbm %s1177_s0, 2048  ;;  %p726_p4 = scmp.lt.u32.totalorder %s902_s25, %s1177_s0 }
  0x17   : > { %p723_p2 = pnand %p722_p1, %p721_p0  ;;  %p727_p5 = scmp.lt.u32.totalorder %s725_s4, %s720_s30 }
  0x18   : > { %p729_p8 = scmp.lt.u32.totalorder %s720_s30, %s902_s25 }
  0x19   : > { %p724_p3 = pneg %p723_p2  ;;  %p728_p7 = por %p727_p5, %p726_p4 }
  0x1b   : > { %p730_p10 = por %p729_p8, %p728_p7 }
  0x1d   : > { %p731_p9 = pnand %p730_p10, %p724_p3 }
  0x1f   : > { %734 = shalt.err (!%p731_p9)
}
  0x20   : > { %s735_s13 = scalar_lea.vmem %s910_s27, 1024  ;;  %s818_s14 = smov [#allocation3]  }
  0x21   : > { %p736_p0 = scmp.ne.s32.totalorder %s910_s27, %s735_s13  ;;  %s740_s16 = sshll.u32 %s818_s14, 4  ;;  %s741_s16 = int_to_ptr.vmem [resolvable:$false] %s740_s16 }
  0x22   : > { %s742_s20 = scalar_lea.vmem %s741_s16, 2048  ;;  %p743_p11 = scmp.lt.s32.totalorder %s910_s27, %s741_s16 }
  0x23   : > { %p738_p2 = pnand %p736_p0, %p722_p1  ;;  %p744_p4 = scmp.lt.s32.totalorder %s742_s20, %s735_s13 }
  0x25   : > { %p739_p12 = pneg %p738_p2  ;;  %p745_p5 = por %p744_p4, %p743_p11 }
  0x27   : > { %p746_p7 = pnand %p745_p5, %p739_p12 }
  0x29   : > { %749 = shalt.err (!%p746_p7)
}
  0x2a   : > { %s819_s21 = smov 128   ;;  %s820_s22 = smov 8  }
  0x2b   : > { %672 = dma.hbm_to_vmem [thread:$0]  (!%p906_p13), %s902_s25, 1024, %s910_s27, %s912_s29, %s819_s21, %s819_s21, %s820_s22  }
  0x2c   : > { %p652_p9 = scmp.ge.s32.totalorder %s816_s9, 1  ;;  %p107_p1 = scmp.lt.s32.totalorder %s816_s9, 3 }
  0x2e   : > { %p108_p3 = pnand %p652_p9, %p107_p1 }
  0x2f   : > { %s943_s23 = sand.u32 (!%p108_p3), 1, %s808_s7  }
  0x30   : > { %111 = sbr.rel (%p108_p3) target bundleno = 406 (0x196), region = 24  ;;  %s653_s24 = sshll.u32 (!%p108_p3), %s943_s23, 6 }
  0x31   : > { %s114_s26 = scalar_lea.sflag (!%p108_p3), [#allocation4], %s943_s23  ;;  %s949_s30 = scalar_lea.vmem (!%p108_p3), [#allocation3], %s653_s24 }
  0x37   : > { %795 = dma.done.wait (%p882_p6), %s114_s26, 1024  }
  0x38   : > { %797 = vsyncadd (%p882_p6), %s114_s26, 4294966272  ;;  %vm146_vm0 = vcmask 15360   ;;  %vm159_vm1 = vcmask 1047696   ;;  %v821_v0 = vmov 0.0   ;;  %v172_v1 = vld [vmem:[%s949_s30] sm:$0xff]  ;;  %v174_v2 = vld [vmem:[%s949_s30 + $0x10] sm:$0xff] }
  0x39   : > { %138 = vst [vmem:[#allocation2] sm:$0x3] %v821_v0  ;;  %148 = vst.msk [vmem:[#allocation2 + $0x8] sm:$0xff] %vm146_vm0, %v821_v0  ;;  %s822_s17 = smov 2   ;;  %v173_v3 = vld [vmem:[%s949_s30 + $0x8] sm:$0xff]  ;;  %v175_v4 = vld [vmem:[%s949_s30 + $0x18] sm:$0xff] }
  0x3a   : > { %139 = vst [vmem:[#allocation2 + $0x18] sm:$0x3] %v821_v0  ;;  %140 = vst [vmem:[#allocation2 + $0x30] sm:$0x3] %v821_v0  ;;  %188 = vrot.lane.b32.xlu0 %v172_v1, %s822_s17  ;;  %192 = vrot.lane.b32.xlu1 %v174_v2, %s822_s17  ;;  %v176_v5 = vld [vmem:[%s949_s30 + $0x20] sm:$0xff]  ;;  %v177_v6 = vld [vmem:[%s949_s30 + $0x28] sm:$0xff] }
  0x3b   : > { %141 = vst [vmem:[#allocation2 + $0x48] sm:$0x3] %v821_v0  ;;  %142 = vst [vmem:[#allocation2 + $0x12] sm:$0x3f] %v821_v0  ;;  %v179_v7 = vld [vmem:[%s949_s30 + $0x38] sm:$0xff]  ;;  %v178_v8 = vld [vmem:[%s949_s30 + $0x30] sm:$0xff] }
  0x3c   : > { %143 = vst [vmem:[#allocation2 + $0x2a] sm:$0x3f] %v821_v0  ;;  %144 = vst [vmem:[#allocation2 + $0x42] sm:$0x3f] %v821_v0  ;;  %vm212_vm2 = vcmask 146448   ;;  %s823_s25 = smov 127  }
  0x3d   : > { %145 = vst [vmem:[#allocation2 + $0x5a] sm:$0x3f] %v821_v0  ;;  %151 = vst.msk [vmem:[#allocation2 + $0x20] sm:$0xff] %vm146_vm0, %v821_v0  ;;  %s824_s27 = smov 126   ;;  %s825_s28 = smov 125   ;;  %vm421_vm3 = vcmask 1046528  }
  0x3e   : > { %154 = vst.msk [vmem:[#allocation2 + $0x38] sm:$0xff] %vm146_vm0, %v821_v0  ;;  %157 = vst.msk [vmem:[#allocation2 + $0x50] sm:$0xff] %vm146_vm0, %v821_v0  ;;  %190 = vrot.lane.b32.xlu0 %v173_v3, %s822_s17  ;;  %194 = vrot.lane.b32.xlu1 %v175_v4, %s822_s17  ;;  %vm458_vm4 = vcmask 1045504   ;;  %vm511_vm5 = vcmask 1044480   ;;  %vm548_vm6 = vcmask 130048   ;;  %s1086_s29 = scalar_lea.vmem [#allocation6], %s653_s24 }
  0x3f   : > { %147 = vst.msk [vmem:[#allocation2] sm:$0xff] %vm146_vm0, %v821_v0  ;;  %150 = vst.msk [vmem:[#allocation2 + $0x18] sm:$0xff] %vm146_vm0, %v821_v0  ;;  %s664_s2 = sshll.u32 %s860_s10, 10  ;;  %s572_s3 = sshll.u32 %s1086_s29, 4  ;;  %s1131_s3 = int_to_ptr.vmem [resolvable:$true] %s572_s3 }
  0x40   : > { %161 = vst.msk [vmem:[#allocation2 + $0x8] sm:$0xff] %vm159_vm1, %v821_v0  ;;  %164 = vst.msk [vmem:[#allocation2 + $0x20] sm:$0xff] %vm159_vm1, %v821_v0  ;;  %s1129_s11 = scalar_lea.hbm %s1178_s1, %s664_s2  ;;  %s558_s13 = scalar_lea.sflag [#allocation5], %s943_s23 }
  0x41   : > { %149 = vst.msk [vmem:[#allocation2 + $0x10] sm:$0xff] %vm146_vm0, %v821_v0  ;;  %152 = vst.msk [vmem:[#allocation2 + $0x28] sm:$0xff] %vm146_vm0, %v821_v0  ;;  %s750_s14 = scalar_lea.vmem %s1131_s3, 1024  ;;  %p1185_p11 = scmp.ne.s32.totalorder %s1182_s18, 0 }
  0x42   : > { %153 = vst.msk [vmem:[#allocation2 + $0x30] sm:$0xff] %vm146_vm0, %v821_v0  ;;  %155 = vst.msk [vmem:[#allocation2 + $0x40] sm:$0xff] %vm146_vm0, %v821_v0  ;;  %196 = vrot.lane.b32.xlu0 %v176_v5, %s822_s17  ;;  %198 = vrot.lane.b32.xlu1 %v177_v6, %s822_s17  ;;  %p751_p6 = scmp.ne.s32.totalorder %s1131_s3, %s750_s14  ;;  %s826_s10 = smov [#allocation6]  }
  0x43   : > { %156 = vst.msk [vmem:[#allocation2 + $0x48] sm:$0xff] %vm146_vm0, %v821_v0  ;;  %158 = vst.msk [vmem:[#allocation2 + $0x58] sm:$0xff] %vm146_vm0, %v821_v0  ;;  %s754_s16 = sshll.u32 %s826_s10, 4  ;;  %s755_s16 = int_to_ptr.vmem [resolvable:$false] %s754_s16 }
  0x44   : > { %167 = vst.msk [vmem:[#allocation2 + $0x38] sm:$0xff] %vm159_vm1, %v821_v0  ;;  %170 = vst.msk [vmem:[#allocation2 + $0x50] sm:$0xff] %vm159_vm1, %v821_v0  ;;  %p752_p12 = pnand %p751_p6, %p1185_p11  ;;  %s756_s20 = scalar_lea.vmem %s755_s16, 2048 }
  0x45   : > { %160 = vst.msk [vmem:[#allocation2] sm:$0xff] %vm159_vm1, %v821_v0  ;;  %163 = vst.msk [vmem:[#allocation2 + $0x18] sm:$0xff] %vm159_vm1, %v821_v0  ;;  %p757_p8 = scmp.lt.s32.totalorder %s1131_s3, %s755_s16  ;;  %p758_p10 = scmp.lt.s32.totalorder %s756_s20, %s750_s14 }
  0x46   : > { %162 = vst.msk [vmem:[#allocation2 + $0x10] sm:$0xff] %vm159_vm1, %v821_v0  ;;  %165 = vst.msk [vmem:[#allocation2 + $0x28] sm:$0xff] %vm159_vm1, %v821_v0  ;;  %202 = vrot.lane.b32.xlu1 %v179_v7, %s822_s17  ;;  %200 = vrot.lane.b32.xlu0 %v178_v8, %s822_s17  ;;  %p753_p13 = pneg %p752_p12 }
  0x47   : > { %166 = vst.msk [vmem:[#allocation2 + $0x30] sm:$0xff] %vm159_vm1, %v821_v0  ;;  %168 = vst.msk [vmem:[#allocation2 + $0x40] sm:$0xff] %vm159_vm1, %v821_v0  ;;  %p759_p0 = por %p758_p10, %p757_p8 }
  0x48   : > { %169 = vst.msk [vmem:[#allocation2 + $0x48] sm:$0xff] %vm159_vm1, %v821_v0  ;;  %171 = vst.msk [vmem:[#allocation2 + $0x58] sm:$0xff] %vm159_vm1, %v821_v0 }
  0x49   : > { %p760_p2 = pnand %p759_p0, %p753_p13 }
  0xac   : > { %v189_v9 = vpop.permute.xlu0 %188  ;;  %v193_v10 = vpop.permute.xlu1 %192 }
  0xad   : > { %213 = vst.msk [vmem:[#allocation2 + $0x2] sm:$0xff] %vm212_vm2, %v189_v9  ;;  %215 = vst.msk [vmem:[#allocation2 + $0x1a] sm:$0xff] %vm212_vm2, %v193_v10 }
  0xb0   : > { %v191_v11 = vpop.permute.xlu0 %190  ;;  %v195_v12 = vpop.permute.xlu1 %194 }
  0xb1   : > { %214 = vst.msk [vmem:[#allocation2 + $0xa] sm:$0xff] %vm212_vm2, %v191_v11  ;;  %216 = vst.msk [vmem:[#allocation2 + $0x22] sm:$0xff] %vm212_vm2, %v195_v12 }
  0xb4   : > { %v991_v13 = vld [vmem:[#allocation2] sm:$0xff]  ;;  %v197_v14 = vpop.permute.xlu0 %196  ;;  %v199_v15 = vpop.permute.xlu1 %198  ;;  %v1004_v20 = vld [vmem:[#allocation2 + $0x18] sm:$0xff] }
  0xb5   : > { %245 = vrot.lane.b32.xlu0 %v991_v13, %s823_s25  ;;  %217 = vst.msk [vmem:[#allocation2 + $0x32] sm:$0xff] %vm212_vm2, %v197_v14  ;;  %218 = vst.msk [vmem:[#allocation2 + $0x3a] sm:$0xff] %vm212_vm2, %v199_v15  ;;  %v233_v48 = vmul.f32 0.125, %v991_v13  ;;  %v236_v51 = vmul.f32 0.125, %v1004_v20 }
  0xb8   : > { %v996_v16 = vld [vmem:[#allocation2 + $0x8] sm:$0xff]  ;;  %v998_v17 = vld [vmem:[#allocation2 + $0x10] sm:$0xff]  ;;  %v203_v18 = vpop.permute.xlu1 %202  ;;  %v201_v19 = vpop.permute.xlu0 %200  ;;  %v1006_v21 = vld [vmem:[#allocation2 + $0x20] sm:$0xff] }
  0xb9   : > { %247 = vrot.lane.b32.xlu1 %v996_v16, %s823_s25  ;;  %249 = vrot.lane.b32.xlu0 %v998_v17, %s823_s25  ;;  %220 = vst.msk [vmem:[#allocation2 + $0x52] sm:$0xff] %vm212_vm2, %v203_v18  ;;  %219 = vst.msk [vmem:[#allocation2 + $0x4a] sm:$0xff] %vm212_vm2, %v201_v19  ;;  %v1010_v22 = vld [vmem:[#allocation2 + $0x28] sm:$0xff]  ;;  %v234_v49 = vmul.f32 0.125, %v996_v16  ;;  %v235_v50 = vmul.f32 0.125, %v998_v17  ;;  %v237_v52 = vmul.f32 0.125, %v1006_v21 }
  0xba   : > { %v238_v56 = vmul.f32 0.125, %v1010_v22 }
  0xbc   : > { %v1012_v23 = vld [vmem:[#allocation2 + $0x30] sm:$0xff]  ;;  %v1016_v24 = vld [vmem:[#allocation2 + $0x38] sm:$0xff]  ;;  %v1018_v25 = vld [vmem:[#allocation2 + $0x40] sm:$0xff] }
  0xbd   : > { %251 = vrot.lane.b32.xlu1 %v1004_v20, %s823_s25  ;;  %253 = vrot.lane.b32.xlu0 %v1006_v21, %s823_s25  ;;  %v239_v57 = vmul.f32 0.125, %v1012_v23  ;;  %v240_v58 = vmul.f32 0.125, %v1016_v24  ;;  %v241_v62 = vmul.f32 0.125, %v1018_v25 }
  0xc0   : > { %v1022_v26 = vld [vmem:[#allocation2 + $0x48] sm:$0xff]  ;;  %v1024_v27 = vld [vmem:[#allocation2 + $0x50] sm:$0xff]  ;;  %v1028_v28 = vld [vmem:[#allocation2 + $0x58] sm:$0xff] }
  0xc1   : > { %255 = vrot.lane.b32.xlu1 %v1010_v22, %s823_s25  ;;  %257 = vrot.lane.b32.xlu0 %v1012_v23, %s823_s25  ;;  %v242_v4 = vmul.f32 0.125, %v1022_v26  ;;  %v243_v6 = vmul.f32 0.125, %v1024_v27  ;;  %v244_v11 = vmul.f32 0.125, %v1028_v28 }
  0xc5   : > { %259 = vrot.lane.b32.xlu1 %v1016_v24, %s823_s25  ;;  %261 = vrot.lane.b32.xlu0 %v1018_v25, %s823_s25 }
  0xc9   : > { %263 = vrot.lane.b32.xlu1 %v1022_v26, %s823_s25  ;;  %265 = vrot.lane.b32.xlu0 %v1024_v27, %s823_s25 }
  0xcd   : > { %267 = vrot.lane.b32.xlu1 %v1028_v28, %s823_s25  ;;  %293 = vrot.lane.b32.xlu0 %v991_v13, %s824_s27 }
  0xd1   : > { %295 = vrot.lane.b32.xlu1 %v996_v16, %s824_s27  ;;  %297 = vrot.lane.b32.xlu0 %v998_v17, %s824_s27 }
  0xd5   : > { %299 = vrot.lane.b32.xlu1 %v1004_v20, %s824_s27  ;;  %301 = vrot.lane.b32.xlu0 %v1006_v21, %s824_s27 }
  0xd9   : > { %303 = vrot.lane.b32.xlu1 %v1010_v22, %s824_s27  ;;  %305 = vrot.lane.b32.xlu0 %v1012_v23, %s824_s27 }
  0xdd   : > { %307 = vrot.lane.b32.xlu1 %v1016_v24, %s824_s27  ;;  %309 = vrot.lane.b32.xlu0 %v1018_v25, %s824_s27 }
  0xe1   : > { %311 = vrot.lane.b32.xlu1 %v1022_v26, %s824_s27  ;;  %313 = vrot.lane.b32.xlu0 %v1024_v27, %s824_s27 }
  0xe5   : > { %315 = vrot.lane.b32.xlu1 %v1028_v28, %s824_s27  ;;  %341 = vrot.lane.b32.xlu0 %v991_v13, %s825_s28 }
  0xe9   : > { %343 = vrot.lane.b32.xlu1 %v996_v16, %s825_s28  ;;  %345 = vrot.lane.b32.xlu0 %v998_v17, %s825_s28 }
  0xed   : > { %347 = vrot.lane.b32.xlu1 %v1004_v20, %s825_s28  ;;  %349 = vrot.lane.b32.xlu0 %v1006_v21, %s825_s28 }
  0xf1   : > { %351 = vrot.lane.b32.xlu1 %v1010_v22, %s825_s28  ;;  %353 = vrot.lane.b32.xlu0 %v1012_v23, %s825_s28 }
  0xf5   : > { %355 = vrot.lane.b32.xlu1 %v1016_v24, %s825_s28  ;;  %357 = vrot.lane.b32.xlu0 %v1018_v25, %s825_s28 }
  0xf9   : > { %359 = vrot.lane.b32.xlu1 %v1022_v26, %s825_s28  ;;  %361 = vrot.lane.b32.xlu0 %v1024_v27, %s825_s28 }
  0xfd   : > { %363 = vrot.lane.b32.xlu1 %v1028_v28, %s825_s28 }
 0x127   : > { %v246_v29 = vpop.permute.xlu0 %245 }
 0x128   : > { %v269_v55 = vmul.f32 0.375, %v246_v29 }
 0x12a   : > { %v281_v9 = vadd.f32 %v269_v55, %v233_v48 }
 0x12b   : > { %v248_v30 = vpop.permute.xlu1 %247  ;;  %v250_v31 = vpop.permute.xlu0 %249 }
 0x12c   : > { %v270_v59 = vmul.f32 0.375, %v248_v30  ;;  %v271_v60 = vmul.f32 0.375, %v250_v31 }
 0x12e   : > { %v282_v13 = vadd.f32 %v270_v59, %v234_v49  ;;  %v283_v14 = vadd.f32 %v271_v60, %v235_v50 }
 0x12f   : > { %v252_v32 = vpop.permute.xlu1 %251  ;;  %v254_v33 = vpop.permute.xlu0 %253 }
 0x130   : > { %v272_v61 = vmul.f32 0.375, %v252_v32  ;;  %v273_v63 = vmul.f32 0.375, %v254_v33 }
 0x132   : > { %v284_v15 = vadd.f32 %v272_v61, %v236_v51  ;;  %v285_v17 = vadd.f32 %v273_v63, %v237_v52 }
 0x133   : > { %v256_v34 = vpop.permute.xlu1 %255  ;;  %v258_v35 = vpop.permute.xlu0 %257 }
 0x134   : > { %v274_v0 = vmul.f32 0.375, %v256_v34  ;;  %v275_v1 = vmul.f32 0.375, %v258_v35 }
 0x136   : > { %v286_v18 = vadd.f32 %v274_v0, %v238_v56  ;;  %v287_v19 = vadd.f32 %v275_v1, %v239_v57 }
 0x137   : > { %v260_v36 = vpop.permute.xlu1 %259  ;;  %v262_v37 = vpop.permute.xlu0 %261 }
 0x138   : > { %v276_v2 = vmul.f32 0.375, %v260_v36  ;;  %v277_v3 = vmul.f32 0.375, %v262_v37 }
 0x13a   : > { %v288_v20 = vadd.f32 %v276_v2, %v240_v58  ;;  %v289_v21 = vadd.f32 %v277_v3, %v241_v62 }
 0x13b   : > { %v264_v38 = vpop.permute.xlu1 %263  ;;  %v266_v39 = vpop.permute.xlu0 %265 }
 0x13c   : > { %v278_v5 = vmul.f32 0.375, %v264_v38  ;;  %v279_v10 = vmul.f32 0.375, %v266_v39 }
 0x13e   : > { %v290_v22 = vadd.f32 %v278_v5, %v242_v4  ;;  %v291_v27 = vadd.f32 %v279_v10, %v243_v6 }
 0x13f   : > { %v268_v40 = vpop.permute.xlu1 %267  ;;  %v294_v41 = vpop.permute.xlu0 %293 }
 0x140   : > { %v317_v12 = vmul.f32 0.375, %v294_v41  ;;  %v280_v16 = vmul.f32 0.375, %v268_v40 }
 0x142   : > { %v329_v29 = vadd.f32 %v317_v12, %v281_v9  ;;  %v292_v28 = vadd.f32 %v280_v16, %v244_v11 }
 0x143   : > { %v296_v42 = vpop.permute.xlu1 %295  ;;  %v298_v43 = vpop.permute.xlu0 %297 }
 0x144   : > { %v318_v23 = vmul.f32 0.375, %v296_v42  ;;  %v319_v24 = vmul.f32 0.375, %v298_v43 }
 0x146   : > { %v330_v39 = vadd.f32 %v318_v23, %v282_v13  ;;  %v331_v40 = vadd.f32 %v319_v24, %v283_v14 }
 0x147   : > { %v300_v44 = vpop.permute.xlu1 %299  ;;  %v302_v45 = vpop.permute.xlu0 %301 }
 0x148   : > { %v320_v30 = vmul.f32 0.375, %v300_v44  ;;  %v321_v32 = vmul.f32 0.375, %v302_v45 }
 0x14a   : > { %v332_v49 = vadd.f32 %v320_v30, %v284_v15  ;;  %v333_v45 = vadd.f32 %v321_v32, %v285_v17 }
 0x14b   : > { %v304_v46 = vpop.permute.xlu1 %303  ;;  %v306_v47 = vpop.permute.xlu0 %305 }
 0x14c   : > { %v322_v33 = vmul.f32 0.375, %v304_v46  ;;  %v323_v34 = vmul.f32 0.375, %v306_v47 }
 0x14e   : > { %v334_v46 = vadd.f32 %v322_v33, %v286_v18  ;;  %v335_v47 = vadd.f32 %v323_v34, %v287_v19 }
 0x14f   : > { %v308_v53 = vpop.permute.xlu1 %307  ;;  %v310_v54 = vpop.permute.xlu0 %309 }
 0x150   : > { %v324_v35 = vmul.f32 0.375, %v308_v53  ;;  %v325_v36 = vmul.f32 0.375, %v310_v54 }
 0x152   : > { %v1067_v55 = vadd.f32 %v324_v35, %v288_v20  ;;  %v1069_v53 = vadd.f32 %v325_v36, %v289_v21 }
 0x153   : > { %v312_v7 = vpop.permute.xlu1 %311  ;;  %v314_v8 = vpop.permute.xlu0 %313 }
 0x154   : > { %v326_v37 = vmul.f32 0.375, %v312_v7  ;;  %v327_v41 = vmul.f32 0.375, %v314_v8 }
 0x156   : > { %v1071_v54 = vadd.f32 %v326_v37, %v290_v22  ;;  %v1073_v57 = vadd.f32 %v327_v41, %v291_v27 }
 0x157   : > { %v316_v25 = vpop.permute.xlu1 %315  ;;  %v342_v26 = vpop.permute.xlu0 %341 }
 0x158   : > { %v365_v31 = vmul.f32 0.125, %v342_v26  ;;  %v328_v42 = vmul.f32 0.375, %v316_v25 }
 0x15a   : > { %v377_v38 = vadd.f32 %v365_v31, %v329_v29  ;;  %v1075_v58 = vadd.f32 %v328_v42, %v292_v28 }
 0x15b   : > { %v344_v43 = vpop.permute.xlu1 %343  ;;  %v346_v48 = vpop.permute.xlu0 %345 }
 0x15c   : > { %v397_v44 = vmul.f32 0.375, %v377_v38  ;;  %v366_v50 = vmul.f32 0.125, %v344_v43  ;;  %v367_v51 = vmul.f32 0.125, %v346_v48  ;;  %v389_v52 = vmul.f32 0.125, %v377_v38 }
 0x15e   : > { %v378_v56 = vadd.f32 %v366_v50, %v330_v39  ;;  %v422_v59 = vrot.slane %v397_v44, 1  ;;  %v379_v60 = vadd.f32 %v367_v51, %v331_v40  ;;  %v459_v3 = vrot.slane %v397_v44, 2 }
 0x15f   : > { %v348_v61 = vpop.permute.xlu1 %347  ;;  %v350_v62 = vpop.permute.xlu0 %349  ;;  %v512_v4 = vrot.slane %v389_v52, 3 }
 0x160   : > { %v390_v63 = vmul.f32 0.125, %v378_v56  ;;  %v398_v0 = vmul.f32 0.375, %v378_v56  ;;  %v368_v1 = vmul.f32 0.125, %v348_v61  ;;  %v369_v2 = vmul.f32 0.125, %v350_v62 }
 0x161   : > { %v399_v5 = vmul.f32 0.375, %v379_v60  ;;  %v495_v6 = vmul.f32 0.125, %v379_v60 }
 0x162   : > { %v423_v7 = vrot.slane %v398_v0, 1  ;;  %v460_v8 = vrot.slane %v398_v0, 2  ;;  %v513_v9 = vrot.slane %v390_v63, 3  ;;  %v380_v10 = vadd.f32 %v368_v1, %v332_v49 }
 0x163   : > { %v425_v11 = vrot.slane %v399_v5, 1  ;;  %v462_v12 = vrot.slane %v399_v5, 2  ;;  %v515_v13 = vrot.slane %v495_v6, 3  ;;  %v381_v14 = vadd.f32 %v369_v2, %v333_v45  ;;  %v352_v15 = vpop.permute.xlu1 %351  ;;  %v354_v16 = vpop.permute.xlu0 %353 }
 0x164   : > { %v424_v17 = vsel %vm421_vm3, %v422_v59, %v423_v7  ;;  %v461_v18 = vsel %vm458_vm4, %v459_v3, %v460_v8  ;;  %v514_v19 = vsel %vm511_vm5, %v512_v4, %v513_v9  ;;  %v391_v20 = vmul.f32 0.125, %v380_v10 }
 0x165   : > { %v450_v21 = vadd.f32 %v424_v17, %v389_v52  ;;  %v426_v22 = vsel %vm421_vm3, %v423_v7, %v425_v11  ;;  %v463_v23 = vsel %vm458_vm4, %v460_v8, %v462_v12  ;;  %v516_v24 = vsel %vm511_vm5, %v513_v9, %v515_v13 }
 0x166   : > { %v451_v25 = vadd.f32 %v426_v22, %v390_v63  ;;  %v400_v26 = vmul.f32 0.375, %v380_v10  ;;  %v517_v27 = vrot.slane %v391_v20, 3  ;;  %v392_v29 = vmul.f32 0.125, %v381_v14 }
 0x167   : > { %v487_v30 = vadd.f32 %v461_v18, %v450_v21  ;;  %v401_v31 = vmul.f32 0.375, %v381_v14  ;;  %v370_v28 = vmul.f32 0.125, %v352_v15  ;;  %v371_v32 = vmul.f32 0.125, %v354_v16  ;;  %v356_v33 = vpop.permute.xlu1 %355  ;;  %v358_v38 = vpop.permute.xlu0 %357 }
 0x168   : > { %v488_v34 = vadd.f32 %v463_v23, %v451_v25  ;;  %v427_v35 = vrot.slane %v400_v26, 1  ;;  %v464_v36 = vrot.slane %v400_v26, 2  ;;  %v518_v37 = vrot.slane %v392_v29, 3 }
 0x169   : > { %v540_v39 = vadd.f32 %v514_v19, %v487_v30  ;;  %v428_v40 = vrot.slane %v401_v31, 1  ;;  %v465_v41 = vrot.slane %v401_v31, 2  ;;  %v382_v42 = vadd.f32 %v370_v28, %v334_v46 }
 0x16a   : > { %v541_v43 = vadd.f32 %v516_v24, %v488_v34  ;;  %v519_v48 = vsel %vm511_vm5, %v517_v27, %v518_v37  ;;  %v383_v49 = vadd.f32 %v371_v32, %v335_v47  ;;  %v372_v44 = vmul.f32 0.125, %v356_v33 }
 0x16b   : > { %549 = vst.msk [vmem:[%s1086_s29] sm:$0xff] %vm548_vm6, %v540_v39  ;;  %v429_v50 = vsel %vm421_vm3, %v427_v35, %v428_v40  ;;  %v466_v51 = vsel %vm458_vm4, %v464_v36, %v465_v41  ;;  %v402_v45 = vmul.f32 0.375, %v382_v42  ;;  %v496_v52 = vmul.f32 0.125, %v382_v42  ;;  %v360_v56 = vpop.permute.xlu1 %359  ;;  %v362_v5 = vpop.permute.xlu0 %361 }
 0x16c   : > { %550 = vst.msk [vmem:[%s1086_s29 + $0x8] sm:$0xff] %vm548_vm6, %v541_v43  ;;  %v452_v46 = vadd.f32 %v429_v50, %v391_v20  ;;  %v393_v59 = vmul.f32 0.125, %v383_v49  ;;  %v403_v47 = vmul.f32 0.375, %v383_v49  ;;  %v384_v60 = vadd.f32 %v372_v44, %v1067_v55 }
 0x16d   : > { %v430_v61 = vrot.slane %v402_v45, 1  ;;  %v467_v62 = vrot.slane %v402_v45, 2  ;;  %v520_v63 = vrot.slane %v496_v52, 3  ;;  %v373_v0 = vmul.f32 0.125, %v358_v38 }
 0x16e   : > { %v489_v1 = vadd.f32 %v466_v51, %v452_v46  ;;  %v432_v2 = vrot.slane %v403_v47, 1  ;;  %v469_v3 = vrot.slane %v403_v47, 2  ;;  %v522_v4 = vrot.slane %v393_v59, 3 }
 0x16f   : > { %v431_v6 = vsel %vm421_vm3, %v428_v40, %v430_v61  ;;  %v468_v7 = vsel %vm458_vm4, %v465_v41, %v467_v62  ;;  %v521_v8 = vsel %vm511_vm5, %v518_v37, %v520_v63  ;;  %v394_v9 = vmul.f32 0.125, %v384_v60  ;;  %v364_v10 = vpop.permute.xlu1 %363 }
 0x170   : > { %v542_v11 = vadd.f32 %v519_v48, %v489_v1  ;;  %v453_v55 = vadd.f32 %v431_v6, %v392_v29  ;;  %v404_v12 = vmul.f32 0.375, %v384_v60  ;;  %v385_v13 = vadd.f32 %v373_v0, %v1069_v53 }
 0x171   : > { %v523_v14 = vrot.slane %v394_v9, 3  ;;  %v374_v15 = vmul.f32 0.125, %v360_v56  ;;  %v375_v16 = vmul.f32 0.125, %v362_v5  ;;  %v376_v17 = vmul.f32 0.125, %v364_v10 }
 0x172   : > { %551 = vst.msk [vmem:[%s1086_s29 + $0x10] sm:$0xff] %vm548_vm6, %v542_v11  ;;  %v490_v18 = vadd.f32 %v468_v7, %v453_v55  ;;  %v433_v19 = vrot.slane %v404_v12, 1  ;;  %v470_v20 = vrot.slane %v404_v12, 2  ;;  %v405_v21 = vmul.f32 0.375, %v385_v13 }
 0x173   : > { %v524_v22 = vsel %vm511_vm5, %v522_v4, %v523_v14  ;;  %v497_v23 = vmul.f32 0.125, %v385_v13  ;;  %v386_v24 = vadd.f32 %v374_v15, %v1071_v54  ;;  %v387_v25 = vadd.f32 %v375_v16, %v1073_v57 }
 0x174   : > { %v543_v26 = vadd.f32 %v521_v8, %v490_v18  ;;  %v434_v53 = vsel %vm421_vm3, %v432_v2, %v433_v19  ;;  %v471_v27 = vsel %vm458_vm4, %v469_v3, %v470_v20  ;;  %v435_v29 = vrot.slane %v405_v21, 1 }
 0x175   : > { %v454_v30 = vadd.f32 %v434_v53, %v393_v59  ;;  %v472_v31 = vrot.slane %v405_v21, 2  ;;  %v525_v28 = vrot.slane %v497_v23, 3  ;;  %v395_v32 = vmul.f32 0.125, %v386_v24 }
 0x176   : > { %552 = vst.msk [vmem:[%s1086_s29 + $0x18] sm:$0xff] %vm548_vm6, %v543_v26  ;;  %v436_v33 = vsel %vm421_vm3, %v433_v19, %v435_v29  ;;  %v406_v34 = vmul.f32 0.375, %v386_v24  ;;  %v396_v35 = vmul.f32 0.125, %v387_v25  ;;  %v407_v54 = vmul.f32 0.375, %v387_v25 }
 0x177   : > { %v491_v36 = vadd.f32 %v471_v27, %v454_v30  ;;  %v455_v57 = vadd.f32 %v436_v33, %v394_v9  ;;  %v473_v37 = vsel %vm458_vm4, %v470_v20, %v472_v31  ;;  %v526_v38 = vsel %vm511_vm5, %v523_v14, %v525_v28 }
 0x178   : > { %v437_v39 = vrot.slane %v406_v34, 1  ;;  %v474_v40 = vrot.slane %v406_v34, 2  ;;  %v527_v41 = vrot.slane %v395_v32, 3  ;;  %v438_v42 = vrot.slane %v407_v54, 1 }
 0x179   : > { %v544_v43 = vadd.f32 %v524_v22, %v491_v36  ;;  %v492_v48 = vadd.f32 %v473_v37, %v455_v57  ;;  %v475_v49 = vrot.slane %v407_v54, 2  ;;  %v528_v44 = vrot.slane %v396_v35, 3 }
 0x17a   : > { %v439_v50 = vsel %vm421_vm3, %v437_v39, %v438_v42  ;;  %v388_v51 = vadd.f32 %v376_v17, %v1075_v58 }
 0x17b   : > { %553 = vst.msk [vmem:[%s1086_s29 + $0x20] sm:$0xff] %vm548_vm6, %v544_v43  ;;  %v545_v45 = vadd.f32 %v526_v38, %v492_v48  ;;  %v456_v52 = vadd.f32 %v439_v50, %v395_v32  ;;  %v476_v56 = vsel %vm458_vm4, %v474_v40, %v475_v49  ;;  %v529_v46 = vsel %vm511_vm5, %v527_v41, %v528_v44 }
 0x17c   : > { %v408_v59 = vmul.f32 0.375, %v388_v51  ;;  %v498_v47 = vmul.f32 0.125, %v388_v51 }
 0x17d   : > { %554 = vst.msk [vmem:[%s1086_s29 + $0x28] sm:$0xff] %vm548_vm6, %v545_v45  ;;  %v493_v60 = vadd.f32 %v476_v56, %v456_v52 }
 0x17e   : > { %v440_v61 = vrot.slane %v408_v59, 1  ;;  %v477_v58 = vrot.slane %v408_v59, 2  ;;  %v530_v62 = vrot.slane %v498_v47, 3 }
 0x17f   : > { %v546_v63 = vadd.f32 %v529_v46, %v493_v60 }
 0x180   : > { %v441_v0 = vsel %vm421_vm3, %v438_v42, %v440_v61  ;;  %v478_v1 = vsel %vm458_vm4, %v475_v49, %v477_v58  ;;  %v531_v2 = vsel %vm511_vm5, %v528_v44, %v530_v62 }
 0x181   : > { %555 = vst.msk [vmem:[%s1086_s29 + $0x30] sm:$0xff] %vm548_vm6, %v546_v63  ;;  %v457_v3 = vadd.f32 %v441_v0, %v396_v35 }
 0x183   : > { %v494_v4 = vadd.f32 %v478_v1, %v457_v3 }
 0x185   : > { %v547_v5 = vadd.f32 %v531_v2, %v494_v4 }
 0x187   : > { %556 = vst.msk [vmem:[%s1086_s29 + $0x38] sm:$0xff] %vm548_vm6, %v547_v5 }
 0x188   : > { %763 = shalt.err (!%p760_p2)
}
 0x189   : > { %s764_s21 = scalar_lea.hbm %s1129_s11, 1024  ;;  %s768_s26 = scalar_lea.hbm %s1178_s1, 2048 }
 0x18a   : > { %p765_p4 = scmp.ne.s32.totalorder %s1129_s11, %s764_s21  ;;  %p769_p9 = scmp.lt.u32.totalorder %s1129_s11, %s1178_s1 }
 0x18b   : > { %p770_p1 = scmp.lt.u32.totalorder %s768_s26, %s764_s21  ;;  %p772_p6 = scmp.lt.u32.totalorder %s764_s21, %s1129_s11 }
 0x18c   : > { %p766_p5 = pnand %p765_p4, %p1185_p11 }
 0x18d   : > { %p771_p3 = por %p770_p1, %p769_p9 }
 0x18e   : > { %p767_p7 = pneg %p766_p5 }
 0x18f   : > { %p773_p12 = por %p772_p6, %p771_p3 }
 0x191   : > { %p774_p13 = pnand %p773_p12, %p767_p7 }
 0x193   : > { %777 = shalt.err (!%p774_p13)
}
 0x194   : > { %s827_s25 = smov 128   ;;  %s828_s27 = smov 8  }
 0x195   : > { %667 = dma.vmem_to_hbm [thread:$0]  (%p1185_p11), %s1131_s3, 1024, %s1129_s11, %s558_s13, %s827_s25, %s827_s25, %s828_s27  }
 0x196 PF: > { %s587_s28 = sand.u32 1, %s804_s6   ;;  %p1186_p8 = scmp.ne.s32.totalorder %s1183_s19, 0 }
 0x197   : > { %p1187_p10 = scmp.ge.s32.totalorder %s816_s9, 2  ;;  %s588_s29 = scalar_lea.sflag [#allocation5], %s587_s28 }
 0x199   : > { %p674_p0 = pnand %p1187_p10, %p1186_p8 }
 0x19b   : > { %799 = dma.done.wait (!%p674_p0), %s588_s29, 1024  }
 0x19c   : > { %801 = vsyncadd (!%p674_p0), %s588_s29, 4294966272  ;;  %p14_p2 = scmp.ge.s32.totalorder %s864_s12, 4   ;;  %s1188_s6 = smov %s808_s7 }
 0x19d   : > { %s1189_s7 = smov %s812_s8  ;;  %s1190_s8 = smov %s876_s15 }
 0x19e   : > { %s1191_s9 = smov %s864_s12  ;;  %16 = sbr.rel (!%p14_p2) target bundleno = 5 (0x5), region = 69 }
 0x1a5   :  { %593 = vsyncpa [#allocation4], 1 }
 0x1a6   :  { %595 = vsyncpa [#allocation4 + $0x1], 1 }
 0x1a7   :  { %596 = vsyncpa [#allocation5], 1 }
 0x1a8   :  { %598 = vsyncpa [#allocation5 + $0x1], 1 }

</bundles_post_ra>
